<compile_context>
chip_gen: v5e
topology: v5e:2x2
jax: 0.10.0
libtpu: 0.0.40
codegen_flags: <defaults>
</compile_context>

<pallas_src>
import functools

import jax
import jax.numpy as jnp
from jax import lax
from jax.experimental import pallas as pl
from jax.experimental.pallas import tpu as pltpu

_LANES = 128
_ACC_SUBLANES = 8


def _loss_kernel(rec_ref, lab_ref, sum_ref, cnt_ref, *, ignore_value,
                 num_classes):
    """One (batch, shard, row-tile) step of the masked -log(p) reduction.

    rec_ref: (1, C, TR, 128)  recon probabilities, native dtype
    lab_ref: (1, TR, 128)     labels (uint8 or int32)
    sum_ref: (1, 1, 8, 128)   f32 partial sum   (revisited across the tile axis)
    cnt_ref: (1, 1, 8, 128)   f32 valid count   (revisited across the tile axis)
    """
    t = pl.program_id(2)

    @pl.when(t == 0)
    def _():
        sum_ref[...] = jnp.zeros_like(sum_ref)
        cnt_ref[...] = jnp.zeros_like(cnt_ref)

    lab = lab_ref[0].astype(jnp.int32)            # (TR, 128)
    valid = lab != ignore_value

    # Gather p = recon[label] with a compare+select chain in recon's NATIVE
    # dtype (no full-block f32 upcast).  Precondition (as in the torch module):
    # non-ignored labels lie in [0, C).
    if num_classes <= 16:
        p = rec_ref[0, 0]
        for c in range(1, num_classes):
            p = jnp.where(lab == c, rec_ref[0, c], p)
    else:
        # Bounded instruction count / vreg live ranges for large class counts.
        p = lax.fori_loop(
            1, num_classes,
            lambda c, acc: jnp.where(lab == c, rec_ref[0, c], acc),
            rec_ref[0, 0])

    # Cast only the gathered value to f32.  Ignored / padded / OOB-tail pixels
    # read 1.0, so -log(1.0) == 0 and they contribute nothing.
    p = jnp.where(valid, p.astype(jnp.float32), 1.0)
    per_pix = -jnp.log(p)                         # (TR, 128) f32
    vld = valid.astype(jnp.float32)

    rows = per_pix.shape[0]
    if rows % _ACC_SUBLANES == 0:
        # Fold rows into a full (8,128) vreg-shaped partial: pure VPU vreg adds
        # and a full-sublane store.  Final reduces happen in the wrapper.
        sum_ref[0, 0] += per_pix.reshape(rows // _ACC_SUBLANES, _ACC_SUBLANES,
                                         _LANES).sum(axis=0)
        cnt_ref[0, 0] += vld.reshape(rows // _ACC_SUBLANES, _ACC_SUBLANES,
                                     _LANES).sum(axis=0)
    else:
        # Tiny-image fallback (whole image fits in one short tile).
        sum_ref[0, 0, 0:1, :] += jnp.sum(per_pix, axis=0, keepdims=True)
        cnt_ref[0, 0, 0:1, :] += jnp.sum(vld, axis=0, keepdims=True)


def loss_without_softmax(recon_label3, label, invisible_p=None, *,
                         loss_weight=1.0, ignore_label=255,
                         block_rows=None, target_block_bytes=6 << 20):
    """recon_label3: (B,C,H,W) probs; label: (B,1,H,W) int;
    invisible_p: optional (B,H,W), pixels == 1.0 are ignored. Returns f32 scalar."""
    B, C, H, W = recon_label3.shape
    S = H * W

    lab = label.reshape(B, S)
    if invisible_p is not None:
        ign = C                                   # sentinel outside [0, C)
        lab = jnp.where(invisible_p.reshape(B, S) == 1.0, ign,
                        lab.astype(jnp.int32))
    elif ignore_label is not None:
        ign = int(ignore_label)
    else:
        raise IOError("either invisible_p or ignore_label must be provided")

    # Lane-dense relayout (R rows of 128 lanes).  recon keeps its native dtype
    # (bf16 inputs are streamed as bf16) and is NOT row-tile padded.
    s128 = -(-S // _LANES) * _LANES
    R = s128 // _LANES

    # Labels as uint8 when they fit: 4x less label HBM traffic.  Keep int32 for
    # tiny images (traffic irrelevant) to stay on the plainest tiling path.
    use_u8 = (0 <= ign <= 255) and (C <= 255) and (R >= 32)
    lab_dtype = jnp.uint8 if use_u8 else jnp.int32
    lab_flat = lab.astype(lab_dtype)

    rec_flat = recon_label3.reshape(B, C, S)
    if s128 != S:
        # Tiny (<128 elem per (b,c)) pad, only when H*W isn't lane-divisible.
        rec_flat = jnp.pad(rec_flat, ((0, 0), (0, 0), (0, s128 - S)))
        lab_flat = jnp.pad(lab_flat, ((0, 0), (0, s128 - S)),
                           constant_values=ign)
    rec2 = rec_flat.reshape(B, C, R, _LANES)
    lab2 = lab_flat.reshape(B, R, _LANES)

    # Row-tile size: ~6 MiB of recon per block, multiple of 32 rows.
    itemsize = jnp.dtype(recon_label3.dtype).itemsize
    if block_rows is None:
        tr = target_block_bytes // (C * _LANES * itemsize)
    else:
        tr = int(block_rows)
    tr = max(32, (tr // 32) * 32)

    if B == 1 and R >= 64:
        # Guarantee >= 2 row tiles so the 2-way shard split below can feed both
        # v7x TensorCores even for a single image (no-op on v5e/v6e).
        tr = min(tr, max(32, ((-(-R // 2) + 31) // 32) * 32))

    if R <= tr:
        tr, total_tiles, num_shards, inner = R, 1, 1, 1
    else:
        total_tiles = -(-R // tr)
        num_shards = 2 if total_tiles >= 2 else 1
        inner = -(-total_tiles // num_shards)

    # Pad ONLY the cheap label stream out to the full tile grid with `ign`;
    # recon's tail tiles are partial edge blocks neutralized by that mask.
    lab_rows = num_shards * inner * tr
    if lab_rows != R:
        lab2 = jnp.pad(lab2, ((0, 0), (0, lab_rows - R), (0, 0)),
                       constant_values=ign)

    last_rb = total_tiles - 1
    if num_shards * inner != total_tiles:
        # Over-provisioned tail tile: clamp to the last in-bounds recon block
        # (its labels are all `ign`, so it contributes nothing).
        rec_map = lambda b, s, t: (b, 0, jnp.minimum(s * inner + t, last_rb), 0)
    else:
        rec_map = lambda b, s, t: (b, 0, s * inner + t, 0)
    lab_map = lambda b, s, t: (b, s * inner + t, 0)
    out_map = lambda b, s, t: (b, s, 0, 0)

    # VMEM budget: 2x double-buffered streams + f32 per-pixel temps + slack.
    rec_blk = C * tr * _LANES * itemsize
    lab_blk = tr * _LANES * jnp.dtype(lab_dtype).itemsize
    vmem_limit = 2 * rec_blk + 2 * lab_blk + 8 * tr * _LANES * 4 + (4 << 20)
    vmem_limit = int(min(max(vmem_limit, 16 << 20), 40 << 20))

    kernel = functools.partial(_loss_kernel, ignore_value=ign, num_classes=C)
    out_blk = (1, 1, _ACC_SUBLANES, _LANES)

    psum, pcnt = pl.pallas_call(
        kernel,
        out_shape=(jax.ShapeDtypeStruct((B, num_shards, _ACC_SUBLANES, _LANES),
                                        jnp.float32),
                   jax.ShapeDtypeStruct((B, num_shards, _ACC_SUBLANES, _LANES),
                                        jnp.float32)),
        grid_spec=pltpu.PrefetchScalarGridSpec(
            num_scalar_prefetch=0,
            grid=(B, num_shards, inner),
            in_specs=[
                pl.BlockSpec((1, C, tr, _LANES), rec_map),
                pl.BlockSpec((1, tr, _LANES), lab_map),
            ],
            out_specs=(pl.BlockSpec(out_blk, out_map),
                       pl.BlockSpec(out_blk, out_map)),
        ),
        # NOTE: recon stream left at the default Buffered(2); bump to
        # pl.Buffered(3) only if profiling shows exposed per-step DMA.
        compiler_params=pltpu.CompilerParams(
            dimension_semantics=("parallel", "parallel", "arbitrary"),
            vmem_limit_bytes=vmem_limit),
    )(rec2, lab2)

    total = jnp.sum(psum)
    count = jnp.sum(pcnt)
    # NaN when count == 0, matching torch's mean of an empty tensor.
    return (loss_weight * total / count).astype(jnp.float32)


def _reference(recon_label3, label, invisible_p=None, *, loss_weight=1.0,
               ignore_label=255):
    lab = label[:, 0].astype(jnp.int32)
    if invisible_p is not None:
        ignore = invisible_p == 1.0
    else:
        ignore = lab == ignore_label
    safe = jnp.where(ignore, 0, lab)
    p = jnp.take_along_axis(recon_label3.astype(jnp.float32),
                            safe[:, None], axis=1)[:, 0]
    per_pix = -jnp.log(p)
    w = jnp.where(ignore, 0.0, 1.0)
    return loss_weight * jnp.sum(per_pix * w) / jnp.sum(w)


if __name__ == "__main__":
    def make_inputs(k, B, C, H, W):
        k1, k2, k3 = jax.random.split(k, 3)
        logits = jax.random.normal(k1, (B, C, H, W), dtype=jnp.float32)
        recon = jax.nn.softmax(logits, axis=1)
        lab = jax.random.randint(k2, (B, 1, H, W), 0, C, dtype=jnp.int32)
        ignore_mask = jax.random.uniform(k3, (B, 1, H, W)) < 0.2
        lab = jnp.where(ignore_mask, 255, lab)
        return recon, lab

    # 1) small image: single-tile path (B=2, C=4, 16x16).
    recon, lab = make_inputs(jax.random.PRNGKey(0), 2, 4, 16, 16)
    out = jax.block_until_ready(
        loss_without_softmax(recon, lab, loss_weight=1.0, ignore_label=255))
    ref = _reference(recon, lab, loss_weight=1.0, ignore_label=255)
    assert jnp.allclose(out, ref, rtol=1e-5, atol=1e-5), (out, ref)

    # 2) forced multi-tile + 2-way shard split with an odd tile count
    #    (exercises the clamped tail tile and the uint8 label path).
    recon, lab = make_inputs(jax.random.PRNGKey(1), 1, 4, 96, 128)
    out = jax.block_until_ready(
        loss_without_softmax(recon, lab, loss_weight=1.0, ignore_label=255,
                             block_rows=32))
    ref = _reference(recon, lab, loss_weight=1.0, ignore_label=255)
    assert jnp.allclose(out, ref, rtol=1e-5, atol=1e-5), (out, ref)

    # 3) invisible_p masking path.
    recon, lab = make_inputs(jax.random.PRNGKey(2), 2, 4, 16, 16)
    lab = lab % 4                      # all labels valid; ignore via invisible_p
    inv = (jax.random.uniform(jax.random.PRNGKey(3), (2, 16, 16)) < 0.3
           ).astype(jnp.float32)
    out = jax.block_until_ready(loss_without_softmax(recon, lab, inv))
    ref = _reference(recon, lab, inv)
    assert jnp.allclose(out, ref, rtol=1e-5, atol=1e-5), (out, ref)

    print("KERNEL_OK")
</pallas_src>

<mosaic_0001>
module attributes {stable_mosaic.version = 11 : i64} {
  func.func @_loss_kernel(%arg0: i32, %arg1: i32, %arg2: i32, %arg3: memref<1x4x2x128xf32, #tpu.memory_space<vmem>>, %arg4: memref<1x2x128xi32, #tpu.memory_space<vmem>>, %arg5: memref<1x1x8x128xf32, #tpu.memory_space<vmem>>, %arg6: memref<1x1x8x128xf32, #tpu.memory_space<vmem>>) attributes {dimension_semantics = [#tpu.dimension_semantics<parallel>, #tpu.dimension_semantics<parallel>, #tpu.dimension_semantics<arbitrary>], iteration_bounds = array<i64: 2, 1, 1>, scalar_prefetch = 0 : i64, scratch_operands = 0 : i64, tpu.core_type = #tpu.core_type<tc>, window_params = [{transform_indices = @transform_0, window_bounds = array<i64: 1, 4, 2, 128>}, {transform_indices = @transform_1, window_bounds = array<i64: 1, 2, 128>}, {transform_indices = @transform_2, window_bounds = array<i64: 1, 1, 8, 128>}, {transform_indices = @transform_3, window_bounds = array<i64: 1, 1, 8, 128>}]} {
    %c0_i32 = arith.constant 0 : i32
    %0 = arith.cmpi eq, %arg2, %c0_i32 : i32
    %1 = arith.extui %0 : i1 to i32
    %c0_i32_0 = arith.constant 0 : i32
    %2 = arith.cmpi ne, %1, %c0_i32_0 : i32
    scf.if %2 {
      %cst_35 = arith.constant 0.000000e+00 : f32
      %47 = vector.broadcast %cst_35 : f32 to vector<1x1x8x128xf32>
      %c0_36 = arith.constant 0 : index
      %c0_37 = arith.constant 0 : index
      %c0_38 = arith.constant 0 : index
      %c0_39 = arith.constant 0 : index
      %48 = vector.load %arg5[%c0_36, %c0_37, %c0_38, %c0_39] : memref<1x1x8x128xf32, #tpu.memory_space<vmem>>, vector<1x1x8x128xf32>
      tpu.vector_store %arg5[%c0_36, %c0_37, %c0_38, %c0_39], %47 {strides = array<i32>} : memref<1x1x8x128xf32, #tpu.memory_space<vmem>>, vector<1x1x8x128xf32>,
      %cst_40 = arith.constant 0.000000e+00 : f32
      %49 = vector.broadcast %cst_40 : f32 to vector<1x1x8x128xf32>
      %c0_41 = arith.constant 0 : index
      %c0_42 = arith.constant 0 : index
      %c0_43 = arith.constant 0 : index
      %c0_44 = arith.constant 0 : index
      %50 = vector.load %arg6[%c0_41, %c0_42, %c0_43, %c0_44] : memref<1x1x8x128xf32, #tpu.memory_space<vmem>>, vector<1x1x8x128xf32>
      tpu.vector_store %arg6[%c0_41, %c0_42, %c0_43, %c0_44], %49 {strides = array<i32>} : memref<1x1x8x128xf32, #tpu.memory_space<vmem>>, vector<1x1x8x128xf32>,
    } else {
    }
    %c0 = arith.constant 0 : index
    %c0_1 = arith.constant 0 : index
    %c0_2 = arith.constant 0 : index
    %3 = vector.load %arg4[%c0, %c0_1, %c0_2] : memref<1x2x128xi32, #tpu.memory_space<vmem>>, vector<1x2x128xi32>
    %4 = vector.shape_cast %3 : vector<1x2x128xi32> to vector<2x128xi32>
    %c255_i32 = arith.constant 255 : i32
    %5 = vector.broadcast %c255_i32 : i32 to vector<2x128xi32>
    %6 = arith.cmpi ne, %4, %5 : vector<2x128xi32>
    %c0_3 = arith.constant 0 : index
    %c0_4 = arith.constant 0 : index
    %c0_5 = arith.constant 0 : index
    %c0_6 = arith.constant 0 : index
    %7 = vector.load %arg3[%c0_3, %c0_4, %c0_5, %c0_6] : memref<1x4x2x128xf32, #tpu.memory_space<vmem>>, vector<1x1x2x128xf32>
    %8 = vector.shape_cast %7 : vector<1x1x2x128xf32> to vector<2x128xf32>
    %c1_i32 = arith.constant 1 : i32
    %9 = vector.broadcast %c1_i32 : i32 to vector<2x128xi32>
    %10 = arith.cmpi eq, %4, %9 : vector<2x128xi32>
    %c0_7 = arith.constant 0 : index
    %c1 = arith.constant 1 : index
    %c0_8 = arith.constant 0 : index
    %c0_9 = arith.constant 0 : index
    %11 = vector.load %arg3[%c0_7, %c1, %c0_8, %c0_9] : memref<1x4x2x128xf32, #tpu.memory_space<vmem>>, vector<1x1x2x128xf32>
    %12 = vector.shape_cast %11 : vector<1x1x2x128xf32> to vector<2x128xf32>
    %13 = arith.select %10, %12, %8 : vector<2x128xi1>, vector<2x128xf32>
    %c2_i32 = arith.constant 2 : i32
    %14 = vector.broadcast %c2_i32 : i32 to vector<2x128xi32>
    %15 = arith.cmpi eq, %4, %14 : vector<2x128xi32>
    %c0_10 = arith.constant 0 : index
    %c2 = arith.constant 2 : index
    %c0_11 = arith.constant 0 : index
    %c0_12 = arith.constant 0 : index
    %16 = vector.load %arg3[%c0_10, %c2, %c0_11, %c0_12] : memref<1x4x2x128xf32, #tpu.memory_space<vmem>>, vector<1x1x2x128xf32>
    %17 = vector.shape_cast %16 : vector<1x1x2x128xf32> to vector<2x128xf32>
    %18 = arith.select %15, %17, %13 : vector<2x128xi1>, vector<2x128xf32>
    %c3_i32 = arith.constant 3 : i32
    %19 = vector.broadcast %c3_i32 : i32 to vector<2x128xi32>
    %20 = arith.cmpi eq, %4, %19 : vector<2x128xi32>
    %c0_13 = arith.constant 0 : index
    %c3 = arith.constant 3 : index
    %c0_14 = arith.constant 0 : index
    %c0_15 = arith.constant 0 : index
    %21 = vector.load %arg3[%c0_13, %c3, %c0_14, %c0_15] : memref<1x4x2x128xf32, #tpu.memory_space<vmem>>, vector<1x1x2x128xf32>
    %22 = vector.shape_cast %21 : vector<1x1x2x128xf32> to vector<2x128xf32>
    %23 = arith.select %20, %22, %18 : vector<2x128xi1>, vector<2x128xf32>
    %cst = arith.constant 1.000000e+00 : f32
    %24 = vector.broadcast %cst : f32 to vector<2x128xf32>
    %25 = arith.select %6, %23, %24 : vector<2x128xi1>, vector<2x128xf32>
    %26 = math.log %25 : vector<2x128xf32>
    %cst_16 = arith.constant 0.000000e+00 : f32
    %27 = vector.broadcast %cst_16 : f32 to vector<2x128xf32>
    %28 = arith.subf %27, %26 : vector<2x128xf32>
    %29 = arith.extui %6 : vector<2x128xi1> to vector<2x128xi32>
    %30 = arith.sitofp %29 : vector<2x128xi32> to vector<2x128xf32>
    %c0_17 = arith.constant 0 : index
    %c0_18 = arith.constant 0 : index
    %c0_19 = arith.constant 0 : index
    %c0_20 = arith.constant 0 : index
    %31 = vector.load %arg5[%c0_17, %c0_18, %c0_19, %c0_20] : memref<1x1x8x128xf32, #tpu.memory_space<vmem>>, vector<1x1x1x128xf32>
    %32 = vector.shape_cast %31 : vector<1x1x1x128xf32> to vector<1x128xf32>
    %cst_21 = arith.constant dense<0.000000e+00> : vector<128xf32>
    %33 = vector.multi_reduction <add>, %28, %cst_21 [0] : vector<2x128xf32> to vector<128xf32>
    %34 = vector.shape_cast %33 : vector<128xf32> to vector<1x128xf32>
    %35 = arith.addf %32, %34 : vector<1x128xf32>
    %c0_22 = arith.constant 0 : index
    %c0_23 = arith.constant 0 : index
    %c0_24 = arith.constant 0 : index
    %c0_25 = arith.constant 0 : index
    %36 = vector.load %arg5[%c0_22, %c0_23, %c0_24, %c0_25] : memref<1x1x8x128xf32, #tpu.memory_space<vmem>>, vector<1x1x1x128xf32>
    %37 = vector.shape_cast %36 : vector<1x1x1x128xf32> to vector<1x128xf32>
    %38 = vector.shape_cast %35 : vector<1x128xf32> to vector<1x1x1x128xf32>
    tpu.vector_store %arg5[%c0_22, %c0_23, %c0_24, %c0_25], %38 {strides = array<i32>} : memref<1x1x8x128xf32, #tpu.memory_space<vmem>>, vector<1x1x1x128xf32>,
    %c0_26 = arith.constant 0 : index
    %c0_27 = arith.constant 0 : index
    %c0_28 = arith.constant 0 : index
    %c0_29 = arith.constant 0 : index
    %39 = vector.load %arg6[%c0_26, %c0_27, %c0_28, %c0_29] : memref<1x1x8x128xf32, #tpu.memory_space<vmem>>, vector<1x1x1x128xf32>
    %40 = vector.shape_cast %39 : vector<1x1x1x128xf32> to vector<1x128xf32>
    %cst_30 = arith.constant dense<0.000000e+00> : vector<128xf32>
    %41 = vector.multi_reduction <add>, %30, %cst_30 [0] : vector<2x128xf32> to vector<128xf32>
    %42 = vector.shape_cast %41 : vector<128xf32> to vector<1x128xf32>
    %43 = arith.addf %40, %42 : vector<1x128xf32>
    %c0_31 = arith.constant 0 : index
    %c0_32 = arith.constant 0 : index
    %c0_33 = arith.constant 0 : index
    %c0_34 = arith.constant 0 : index
    %44 = vector.load %arg6[%c0_31, %c0_32, %c0_33, %c0_34] : memref<1x1x8x128xf32, #tpu.memory_space<vmem>>, vector<1x1x1x128xf32>
    %45 = vector.shape_cast %44 : vector<1x1x1x128xf32> to vector<1x128xf32>
    %46 = vector.shape_cast %43 : vector<1x128xf32> to vector<1x1x1x128xf32>
    tpu.vector_store %arg6[%c0_31, %c0_32, %c0_33, %c0_34], %46 {strides = array<i32>} : memref<1x1x8x128xf32, #tpu.memory_space<vmem>>, vector<1x1x1x128xf32>,
    return
  }
  func.func @transform_0(%arg0: i32, %arg1: i32, %arg2: i32) -> (i32, i32, i32, i32) {
    %c1_i32 = arith.constant 1 : i32
    %0 = arith.muli %arg1, %c1_i32 : i32
    %1 = arith.addi %0, %arg2 : i32
    %c0_i32 = arith.constant 0 : i32
    %c0_i32_0 = arith.constant 0 : i32
    %c0_i32_1 = arith.constant 0 : i32
    return %arg0, %c0_i32, %1, %c0_i32_0 : i32, i32, i32, i32
  }
  func.func @transform_1(%arg0: i32, %arg1: i32, %arg2: i32) -> (i32, i32, i32) {
    %c1_i32 = arith.constant 1 : i32
    %0 = arith.muli %arg1, %c1_i32 : i32
    %1 = arith.addi %0, %arg2 : i32
    %c0_i32 = arith.constant 0 : i32
    %c0_i32_0 = arith.constant 0 : i32
    return %arg0, %1, %c0_i32 : i32, i32, i32
  }
  func.func @transform_2(%arg0: i32, %arg1: i32, %arg2: i32) -> (i32, i32, i32, i32) {
    %c0_i32 = arith.constant 0 : i32
    %c0_i32_0 = arith.constant 0 : i32
    %c0_i32_1 = arith.constant 0 : i32
    return %arg0, %arg1, %c0_i32, %c0_i32_0 : i32, i32, i32, i32
  }
  func.func @transform_3(%arg0: i32, %arg1: i32, %arg2: i32) -> (i32, i32, i32, i32) {
    %c0_i32 = arith.constant 0 : i32
    %c0_i32_0 = arith.constant 0 : i32
    %c0_i32_1 = arith.constant 0 : i32
    return %arg0, %arg1, %c0_i32, %c0_i32_0 : i32, i32, i32, i32
  }
}

</mosaic_0001>

<bundles_post_ra>
// kernel: tpu_custom_call.1
= control target key start
LH: loop header
LB: loop body
LE: loop exit
PB: predicated region body
PF: predicated region fallthrough
CT: control target
= control target key end

     0   :  { %9 = vsyncpa [#allocation3], 0  ;;  %s982_s0 = inlined_call_operand.hbm [shape: f32[2,4,2,128], index: 0, kind: input, shape index: {}]   ;;  %s983_s1 = inlined_call_operand.hbm [shape: s32[2,2,128], index: 1, kind: input, shape index: {}]   ;;  %s984_s2 = inlined_call_operand.hbm [shape: f32[2,1,8,128], index: 2, kind: output, shape index: {0}]   ;;  %s985_s3 = inlined_call_operand.hbm [shape: f32[2,1,8,128], index: 3, kind: output, shape index: {1}]  }
   0x1   :  { %11 = vsyncpa [#allocation3 + $0x1], 0 }
   0x2   :  { %12 = vsyncpa [#allocation6], 0 }
   0x3   :  { %14 = vsyncpa [#allocation6 + $0x1], 0 }
   0x4   :  { %15 = vsyncpa [#allocation4], 0 }
   0x5   :  { %17 = vsyncpa [#allocation4 + $0x1], 0 }
   0x6   :  { %18 = vsyncpa [#allocation9], 0 }
   0x7   :  { %20 = vsyncpa [#allocation9 + $0x1], 0  ;;  %s812_s12 = smov 0   ;;  %s814_s13 = smov 0  }
   0x8   :  { %s816_s14 = smov 0   ;;  %s818_s15 = smov 0  }
   0x9   :  { %s820_s16 = smov 0   ;;  %s822_s17 = smov 0  }
   0xa LB: > { %s507_s18 = sadd.s32 4294967295, %s787_s17   ;;  %s508_s19 = sadd.s32 4294967294, %s787_s17   ;;  %s787_s17 = sphi %s822_s17, %s26_s17   ;;  %s783_s16 = sphi %s820_s16, %s995_s16   ;;  %s779_s15 = sphi %s818_s15, %s994_s15   ;;  %s775_s14 = sphi %s816_s14, %s993_s14   ;;  %s771_s13 = sphi %s814_s13, %s992_s13   ;;  %s767_s12 = sphi %s812_s12, %s991_s12  }
   0xb   : > { %s45_s20 = sadd.s32 1, %s783_s16  ;;  %s56_s21 = sadd.s32 1, %s775_s14 }
   0xc   : > { %p47_p0 = scmp.ge.s32.totalorder %s45_s20, 2  ;;  %p63_p1 = scmp.ne.s32.totalorder %s775_s14, %s771_s13 }
   0xd   : > { %p64_p2 = scmp.eq.s32.totalorder %s787_s17, 0  ;;  %p69_p3 = scmp.ne.s32.totalorder %s771_s13, %s767_s12 }
   0xe   : > { %s997_s20 = smov (%p47_p0, %s45_s20), 0  ;;  %p70_p5 = scmp.eq.s32.totalorder %s507_s18, 0 }
   0xf   : > { %p853_p4 = por %p64_p2, %p63_p1  ;;  %s51_s23 = ssub.s32 %s783_s16, %s997_s20 }
  0x10   : > { %p125_p6 = scmp.eq.s32.totalorder %s507_s18, 1  ;;  %p54_p7 = scmp.eq.s32.totalorder %s51_s23, 0 }
  0x11   : > { %p859_p8 = por %p70_p5, %p69_p3  ;;  %p131_p10 = scmp.eq.s32.totalorder %s508_s19, 1 }
  0x12   : > { %p863_p9 = por %p125_p6, %p63_p1  ;;  %p510_p12 = scmp.ge.s32.totalorder %s787_s17, 2 }
  0x13   : > { %s868_s26 = scalar_select %p54_p7, %s775_s14, %s56_s21  }
  0x14   : > { %p870_p11 = por %p131_p10, %p69_p3  ;;  %p554_p13 = scmp.lt.s32.totalorder %s787_s17, 2 }
  0x15   : > { %s179_s28 = sand.u32 1, %s775_s14   ;;  %s531_s30 = sshll.u32 %s783_s16, 3 }
  0x16   : > { %s511_s29 = sshll.u32 %s179_s28, 3  ;;  %s190_s6 = scalar_lea.hbm %s982_s0, %s531_s30 }
  0x17   : > { %s183_s7 = scalar_lea.vmem [#allocation2], %s511_s29  ;;  %s191_s9 = sshll.u32 %s190_s6, 4  ;;  %s192_s9 = int_to_ptr.hbm [resolvable:$true] %s191_s9 }
  0x18   : > { %s193_s8 = sshll.u32 %s183_s7, 4  ;;  %p883_p0 = pnand %p554_p13, %p853_p4  ;;  %s194_s8 = int_to_ptr.vmem [resolvable:$true] %s193_s8 }
  0x19   : > { %p516_p1 = scmp.ge.s32.totalorder %s787_s17, 1  ;;  %s180_s11 = scalar_lea.sflag [#allocation3], %s179_s28 }
  0x1a   : > { %s789_s18 = smov 32   ;;  %s790_s19 = smov 2  }
  0x1b   : > { %543 = dma.hbm_to_vmem [thread:$0]  (!%p883_p0), %s192_s9, 128, %s194_s8, %s180_s11, %s789_s18, %s789_s18, %s790_s19  }
  0x1c   : > { %p222_p2 = scmp.lt.s32.totalorder %s787_s17, 3  ;;  %s514_s21 = sshll.u32 %s179_s28, 1 }
  0x1d   : > { %s515_s23 = sshll.u32 %s783_s16, 1  ;;  %s207_s4 = scalar_lea.vmem [#allocation5], %s514_s21 }
  0x1e   : > { %p223_p3 = pnand %p516_p1, %p222_p2  ;;  %s213_s22 = scalar_lea.hbm %s983_s1, %s515_s23 }
  0x1f   : > { %s217_s5 = sshll.u32 %s207_s4, 4  ;;  %s215_s6 = sshll.u32 %s213_s22, 4  ;;  %s218_s5 = int_to_ptr.vmem [resolvable:$true] %s217_s5  ;;  %s216_s6 = int_to_ptr.hbm [resolvable:$true] %s215_s6 }
  0x20   : > { %s204_s7 = scalar_lea.sflag [#allocation6], %s179_s28  ;;  %226 = sbr.rel (%p223_p3) target bundleno = 77 (0x4d), region = 28 }
  0x21   : > { %546 = dma.hbm_to_vmem [thread:$0]  (!%p883_p0), %s216_s6, 32, %s218_s5, %s204_s7  }
  0x22   : > { %s898_s8 = sand.u32 (!%p223_p3), 1, %s771_s13  }
  0x23   : > { %s517_s9 = sshll.u32 (!%p223_p3), %s898_s8, 3  ;;  %s229_s11 = scalar_lea.sflag (!%p223_p3), [#allocation3], %s898_s8 }
  0x24   : > { %s232_s18 = scalar_lea.vmem (!%p223_p3), [#allocation2], %s517_s9 }
  0x25   : > { %750 = dma.done.wait (%p859_p8), %s229_s11, 128  }
  0x26   : > { %752 = vsyncadd (%p859_p8), %s229_s11, 4294967168  ;;  %s518_s28 = sshll.u32 %s898_s8, 1  ;;  %s239_s10 = scalar_lea.sflag [#allocation6], %s898_s8 }
  0x27   : > { %s242_s19 = scalar_lea.vmem [#allocation5], %s518_s28 }
  0x28   : > { %754 = dma.done.wait (%p859_p8), %s239_s10, 32  }
  0x29   : > { %756 = vsyncadd (%p859_p8), %s239_s10, 4294967264  ;;  %s912_s21 = scalar_lea.vmem [#allocation7], %s517_s9  ;;  %v791_v0 = vmov 0.0   ;;  %s915_s23 = scalar_lea.vmem [#allocation8], %s517_s9  ;;  %vm306_vm0 = vcmask 1041408  }
  0x2a   : > { %282 = vst [vmem:[%s912_s21] sm:$0xff] %v791_v0  ;;  %v284_v1 = vld [vmem:[%s242_s19] sm:$0x3]  ;;  %v286_v2 = vld [vmem:[%s232_s18] sm:$0x3]  ;;  %v521_v3 = vld [vmem:[%s232_s18 + $0x2] sm:$0x3] }
  0x2b   : > { %283 = vst [vmem:[%s915_s23] sm:$0xff] %v791_v0  ;;  %vm285_vm1 = vcmp.ne.s32.totalorder %v284_v1, 255  ;;  %vm287_vm2 = vcmp.eq.s32.totalorder %v284_v1, 1  ;;  %vm291_vm3 = vcmp.eq.s32.totalorder %v284_v1, 2  ;;  %v522_v4 = vld [vmem:[%s232_s18 + $0x4] sm:$0x3]  ;;  %vm295_vm4 = vcmp.eq.s32.totalorder %v284_v1, 3 }
  0x2c   : > { %v290_v5 = vsel %vm287_vm2, %v521_v3, %v286_v2  ;;  %v523_v6 = vld [vmem:[%s232_s18 + $0x6] sm:$0x3]  ;;  %v524_v7 = vsel %vm285_vm1, 1.0, %v791_v0  ;;  %s527_s24 = sshll.u32 %s779_s15, 3  ;;  %s360_s4 = sshll.u32 %s915_s23, 4  ;;  %s361_s4 = int_to_ptr.vmem [resolvable:$true] %s360_s4 }
  0x2d   : > { %v294_v8 = vsel %vm291_vm3, %v522_v4, %v290_v5  ;;  %v317_v9 = vsel %vm306_vm0, %v524_v7, 0.0  ;;  %s358_s22 = scalar_lea.hbm %s985_s3, %s527_s24  ;;  %s332_s6 = scalar_lea.sflag [#allocation9], %s898_s8 }
  0x2e   : > { %v298_v10 = vsel %vm295_vm4, %v523_v6, %v294_v8  ;;  %v318_v11 = vrot.slane %v317_v9, 4  ;;  %s362_s5 = sshll.u32 %s358_s22, 4  ;;  %s689_s28 = scalar_lea.hbm %s985_s3, 16  ;;  %s363_s5 = int_to_ptr.hbm [resolvable:$true] %s362_s5 }
  0x2f   : > { %v299_v12 = vsel %vm285_vm1, %v298_v10, 1.0  ;;  %s683_s7 = sshra.s32 %s363_s5, 4  ;;  %s684_s7 = int_to_ptr.hbm [resolvable:$true] %s683_s7 }
  0x30   : > { %607 = vlog2.f32 %v299_v12  ;;  %v319_v13 = vadd.f32 %v318_v11, %v317_v9  ;;  %s685_s9 = scalar_lea.hbm %s684_s7, 8  ;;  %p690_p7 = scmp.lt.s32.totalorder %s684_s7, %s985_s3 }
  0x31   : > { %p686_p4 = scmp.ne.s32.totalorder %s684_s7, %s685_s9  ;;  %p691_p8 = scmp.lt.s32.totalorder %s689_s28, %s685_s9 }
  0x32   : > { %v320_v14 = vrot.slane %v319_v13, 2  ;;  %v316_v19 = vld [vmem:[%s915_s23] sm:$0x1] }
  0x33   : > { %p687_p5 = pnand %p686_p4, %p863_p9  ;;  %p692_p10 = por %p691_p8, %p690_p7 }
  0x34   : > { %v321_v15 = vadd.f32 %v320_v14, %v319_v13 }
  0x35   : > { %p688_p6 = pneg %p687_p5 }
  0x36   : > { %v608_v16 = vpop.eup %607  ;;  %v322_v17 = vrot.slane %v321_v15, 1 }
  0x37   : > { %v301_v18 = vmul.f32 0.6931472, %v608_v16  ;;  %p693_p13 = pnand %p692_p10, %p688_p6 }
  0x38   : > { %v323_v20 = vadd.f32 %v322_v17, %v321_v15 }
  0x39   : > { %v302_v21 = vsub.f32 0.0, %v301_v18 }
  0x3a   : > { %v324_v22 = vadd.f32 %v323_v20, %v316_v19 }
  0x3b   : > { %v307_v23 = vsel %vm306_vm0, %v302_v21, 0.0 }
  0x3c   : > { %v308_v24 = vrot.slane %v307_v23, 4  ;;  %325 = vst [vmem:[%s915_s23] sm:$0x1] %v324_v22 }
  0x3d   : > { %696 = shalt.err (!%p693_p13)
}
  0x3e   : > { %537 = dma.vmem_to_hbm [thread:$0]  (%p863_p9), %s361_s4, 128, %s363_s5, %s332_s6   ;;  %v309_v25 = vadd.f32 %v308_v24, %v307_v23  ;;  %v305_v29 = vld [vmem:[%s912_s21] sm:$0x1] }
  0x3f   : > { %s343_s30 = scalar_lea.hbm %s984_s2, %s527_s24  ;;  %s345_s22 = sshll.u32 %s912_s21, 4  ;;  %s346_s22 = int_to_ptr.vmem [resolvable:$true] %s345_s22 }
  0x40   : > { %v310_v26 = vrot.slane %v309_v25, 2  ;;  %s347_s7 = sshll.u32 %s343_s30, 4  ;;  %s327_s9 = scalar_lea.sflag [#allocation4], %s898_s8  ;;  %s348_s7 = int_to_ptr.hbm [resolvable:$true] %s347_s7 }
  0x41   : > { %s711_s4 = sshra.s32 %s348_s7, 4  ;;  %s717_s24 = scalar_lea.hbm %s984_s2, 16  ;;  %s712_s4 = int_to_ptr.hbm [resolvable:$true] %s711_s4 }
  0x42   : > { %v311_v27 = vadd.f32 %v310_v26, %v309_v25  ;;  %s713_s5 = scalar_lea.hbm %s712_s4, 8  ;;  %p718_p3 = scmp.lt.s32.totalorder %s712_s4, %s984_s2 }
  0x43   : > { %p714_p0 = scmp.ne.s32.totalorder %s712_s4, %s713_s5  ;;  %p719_p4 = scmp.lt.s32.totalorder %s717_s24, %s713_s5 }
  0x44   : > { %v312_v28 = vrot.slane %v311_v27, 1 }
  0x45   : > { %p715_p1 = pnand %p714_p0, %p863_p9  ;;  %p720_p5 = por %p719_p4, %p718_p3 }
  0x46   : > { %v313_v30 = vadd.f32 %v312_v28, %v311_v27 }
  0x47   : > { %p716_p2 = pneg %p715_p1 }
  0x48   : > { %v314_v31 = vadd.f32 %v313_v30, %v305_v29 }
  0x49   : > { %p721_p6 = pnand %p720_p5, %p716_p2 }
  0x4a   : > { %315 = vst [vmem:[%s912_s21] sm:$0x1] %v314_v31 }
  0x4b   : > { %724 = shalt.err (!%p721_p6)
}
  0x4c   : > { %536 = dma.vmem_to_hbm [thread:$0]  (%p863_p9), %s346_s22, 128, %s348_s7, %s327_s9  }
  0x4d PF: > { %s374_s8 = sand.u32 1, %s767_s12   ;;  %p548_p7 = pnand %p510_p12, %p870_p11 }
  0x4e   : > { %s375_s21 = scalar_lea.sflag [#allocation4], %s374_s8 }
  0x4f   : > { %p549_p8 = pneg %p548_p7 }
  0x51   : > { %758 = dma.done.wait (%p549_p8), %s375_s21, 128  }
  0x52   : > { %760 = vsyncadd (%p549_p8), %s375_s21, 4294967168  ;;  %s385_s28 = scalar_lea.sflag [#allocation9], %s374_s8 }
  0x53   : > { %762 = dma.done.wait (%p549_p8), %s385_s28, 128  }
  0x54   : > { %764 = vsyncadd (%p549_p8), %s385_s28, 4294967168  ;;  %s26_s17 = sadd.s32 1, %s787_s17   ;;  %s991_s12 = smov %s771_s13 }
  0x55   : > { %p23_p10 = scmp.ge.s32.totalorder %s26_s17, 4   ;;  %s992_s13 = smov %s775_s14 }
  0x56   : > { %s993_s14 = smov %s868_s26  ;;  %s994_s15 = smov %s783_s16 }
  0x57   : > { %s995_s16 = smov %s997_s20  ;;  %25 = sbr.rel (!%p23_p10) target bundleno = 10 (0xa), region = 110 }
  0x5c   :  { %391 = vsyncpa [#allocation3], 1 }
  0x5d   :  { %393 = vsyncpa [#allocation3 + $0x1], 1 }
  0x5e   :  { %394 = vsyncpa [#allocation6], 1 }
  0x5f   :  { %396 = vsyncpa [#allocation6 + $0x1], 1 }
  0x60   :  { %397 = vsyncpa [#allocation4], 1 }
  0x61   :  { %399 = vsyncpa [#allocation4 + $0x1], 1 }
  0x62   :  { %400 = vsyncpa [#allocation9], 1 }
  0x63   :  { %402 = vsyncpa [#allocation9 + $0x1], 1 }

</bundles_post_ra>
